<compile_context>
chip_gen: v7x
topology: tpu7x:2x2x1
jax: 0.10.0
libtpu: 0.0.40
codegen_flags: <defaults>
</compile_context>

<pallas_src>
import jax
import jax.numpy as jnp
from jax.experimental import pallas as pl
from jax.experimental.pallas import tpu as pltpu

BN_EPS = 1e-5


def _vmem_limit_bytes() -> int:
    """Scoped-VMEM limit derived from the chip (v5e/v6e ~64MiB, v7x ~32MiB)."""
    try:
        cap = int(pltpu.get_tpu_info().vmem_capacity_bytes)
    except Exception:
        cap = 64 * 1024 * 1024
    return max(32 * 1024 * 1024, min(96 * 1024 * 1024, cap // 2))


def _pick_hw_tile(hw: int, per_lane_bytes: int, vmem_limit: int) -> int:
    """Largest lane-dense HW tile (multiple of 128) fitting half the VMEM budget."""
    budget = vmem_limit // 2  # headroom for weights / stats / internal scratch
    t = budget // max(per_lane_bytes, 1)
    t = min(t, 8192, hw)
    if t >= hw:
        return hw  # single full-extent block (always a legal block shape)
    return max(128, (t // 128) * 128)


@jax.jit
def downsample_forward(x_nchw, w_oihw, gamma, beta):
    """x_nchw: (N, Cin, H, W); w_oihw: (Cout, Cin, 1, 1); gamma/beta: (Cout,)."""
    f32 = jnp.float32
    n, cin, h, w_sp = x_nchw.shape
    cout = w_oihw.shape[0]
    hw = h * w_sp

    x3 = x_nchw.reshape(n, cin, hw)                      # native dtype, free reshape
    w_mat = w_oihw.reshape(cout, cin).astype(x3.dtype)   # tiny cast (Cout x Cin)
    out_dtype = x3.dtype

    xb = x3.dtype.itemsize
    ob = jnp.dtype(out_dtype).itemsize
    vmem_limit = _vmem_limit_bytes()
    per_lane = 2 * (cin * xb + cout * ob)                # pass-2 double-buffered bytes/lane
    tile_hw = _pick_hw_tile(hw, per_lane, vmem_limit)
    num_t = pl.cdiv(hw, tile_hw)

    # Extra "parallel" split of the HW tiles so v7x's 2 TensorCores both get work
    # in the stats pass even when N=1 (no effect on v5e/v6e: single TC).
    p_split = 2 if num_t >= 2 else 1
    num_ti = pl.cdiv(num_t, p_split)

    # ------------- Pass 1: batch statistics from x (stats only, no y) -------------
    def stats_kernel(x_ref, g_ref, s_ref):
        ti = pl.program_id(2)

        @pl.when(ti == 0)
        def _():
            g_ref[...] = jnp.zeros_like(g_ref)
            s_ref[...] = jnp.zeros_like(s_ref)

        # Mask lanes past hw (partial last tile / clamped over-run tiles).
        t_global = pl.program_id(1) * num_ti + ti
        valid = hw - t_global * tile_hw
        lane = jax.lax.broadcasted_iota(jnp.int32, x_ref.shape, 1)
        xv = x_ref[...]
        xm = jnp.where(lane < valid, xv, jnp.zeros_like(xv))

        # Gram matrix on the MXU, f32 accumulation: G += X @ X^T (contract over HW).
        g_ref[...] += jax.lax.dot_general(
            xm, xm, (((1,), (1,)), ((), ())), preferred_element_type=jnp.float32)
        s_ref[...] += jnp.sum(xm.astype(jnp.float32), axis=1, keepdims=True)

    def x_stats_map(i, p, ti):
        t = jnp.minimum(p * num_ti + ti, num_t - 1)      # clamp over-run tiles
        return (i, 0, t)

    g_part, s_part = pl.pallas_call(
        stats_kernel,
        out_shape=(
            jax.ShapeDtypeStruct((n, p_split, cin, cin), f32),
            jax.ShapeDtypeStruct((n, p_split, cin, 1), f32),
        ),
        grid_spec=pltpu.PrefetchScalarGridSpec(
            num_scalar_prefetch=0,
            grid=(n, p_split, num_ti),
            in_specs=[pl.BlockSpec((None, cin, tile_hw), x_stats_map)],
            out_specs=[
                pl.BlockSpec((None, None, cin, cin), lambda i, p, ti: (i, p, 0, 0)),
                pl.BlockSpec((None, None, cin, 1), lambda i, p, ti: (i, p, 0, 0)),
            ],
        ),
        compiler_params=pltpu.CompilerParams(
            dimension_semantics=("parallel", "parallel", "arbitrary"),
            vmem_limit_bytes=vmem_limit,
        ),
        cost_estimate=pl.CostEstimate(
            flops=2 * n * hw * cin * cin,
            transcendentals=0,
            bytes_accessed=xb * n * cin * hw + 4 * n * p_split * cin * (cin + 1),
        ),
    )(x3)

    # ------ Fold BN (training-mode batch stats) into per-channel scale / shift ------
    m_total = f32(n * hw)
    g_tot = jnp.sum(g_part, axis=(0, 1))                 # (Cin, Cin)
    s_tot = jnp.sum(s_part, axis=(0, 1))[:, 0]           # (Cin,)
    w_f32 = w_mat.astype(f32)                            # (Cout, Cin)
    mean = (w_f32 @ s_tot) / m_total                     # (Cout,)
    ey2 = jnp.sum((w_f32 @ g_tot) * w_f32, axis=1) / m_total
    var = jnp.maximum(ey2 - mean * mean, 0.0)            # biased variance (PyTorch norm)
    scale = gamma.astype(f32) * jax.lax.rsqrt(var + BN_EPS)
    shift = beta.astype(f32) - mean * scale
    # TODO(synk): running_mean / running_var buffer updates (training side effect)
    # are not emitted; only the forward output is produced.

    # ------------- Pass 2: fused 1x1 conv + BN, single write of the output -------------
    def conv_bn_kernel(x_ref, w_ref, scale_ref, shift_ref, o_ref):
        y = jnp.dot(w_ref[...], x_ref[...], preferred_element_type=jnp.float32)
        o_ref[...] = (y * scale_ref[...] + shift_ref[...]).astype(o_ref.dtype)

    out = pl.pallas_call(
        conv_bn_kernel,
        out_shape=jax.ShapeDtypeStruct((n, cout, hw), out_dtype),
        grid_spec=pltpu.PrefetchScalarGridSpec(
            num_scalar_prefetch=0,
            grid=(n, num_t),
            in_specs=[
                pl.BlockSpec((None, cin, tile_hw), lambda i, t: (i, 0, t)),
                pl.BlockSpec((cout, cin), lambda i, t: (0, 0)),
                pl.BlockSpec((cout, 1), lambda i, t: (0, 0)),
                pl.BlockSpec((cout, 1), lambda i, t: (0, 0)),
            ],
            out_specs=pl.BlockSpec((None, cout, tile_hw), lambda i, t: (i, 0, t)),
        ),
        compiler_params=pltpu.CompilerParams(
            dimension_semantics=("parallel", "parallel"),
            vmem_limit_bytes=vmem_limit,
        ),
        cost_estimate=pl.CostEstimate(
            flops=2 * n * hw * cin * cout,
            transcendentals=0,
            bytes_accessed=xb * n * cin * hw + ob * n * cout * hw + 4 * cout * (cin + 2),
        ),
    )(x3, w_mat, scale.reshape(cout, 1), shift.reshape(cout, 1))

    return out.reshape(n, cout, h, w_sp)


def _reference(x_nchw, w_oihw, gamma, beta):
    """Plain-JAX reference of Conv2d(1x1, bias=False) + BatchNorm2d (training stats)."""
    n, cin, h, w_sp = x_nchw.shape
    cout = w_oihw.shape[0]
    x_flat = jnp.transpose(x_nchw, (0, 2, 3, 1)).reshape(-1, cin).astype(jnp.float32)
    y = x_flat @ w_oihw.reshape(cout, cin).astype(jnp.float32).T   # (M, Cout)
    mean = jnp.mean(y, axis=0, keepdims=True)
    var = jnp.mean((y - mean) ** 2, axis=0, keepdims=True)
    out = (y - mean) / jnp.sqrt(var + BN_EPS) * gamma.reshape(1, -1) + beta.reshape(1, -1)
    out = out.reshape(n, h, w_sp, cout)
    return jnp.transpose(out, (0, 3, 1, 2))


if __name__ == "__main__":
    key = jax.random.PRNGKey(0)
    k_x, k_w = jax.random.split(key)

    N, CIN, COUT, H, W = 2, 4, 8, 16, 16

    x = jax.random.normal(k_x, (N, CIN, H, W), dtype=jnp.float32)
    # Shapes match nn.Conv2d(in_ch, out_ch, 1, bias=False) + nn.BatchNorm2d(out_ch).
    w_conv = jax.random.normal(k_w, (COUT, CIN, 1, 1), dtype=jnp.float32) * 0.1
    gamma = jnp.ones((COUT,), dtype=jnp.float32)   # BN weight init
    beta = jnp.zeros((COUT,), dtype=jnp.float32)   # BN bias init

    out = downsample_forward(x, w_conv, gamma, beta)
    out = jax.block_until_ready(out)

    ref = _reference(x, w_conv, gamma, beta)
    assert out.shape == (N, COUT, H, W)
    assert jnp.allclose(out.astype(jnp.float32), ref, atol=1e-4, rtol=1e-4), "mismatch vs reference"

    print("KERNEL_OK")
</pallas_src>

<mosaic_0001>
module attributes {stable_mosaic.version = 11 : i64} {
  func.func @stats_kernel(%arg0: i32, %arg1: i32, %arg2: i32, %arg3: memref<1x4x256xf32, #tpu.memory_space<vmem>>, %arg4: memref<1x1x4x4xf32, #tpu.memory_space<vmem>>, %arg5: memref<1x1x4x1xf32, #tpu.memory_space<vmem>>) attributes {dimension_semantics = [#tpu.dimension_semantics<parallel>, #tpu.dimension_semantics<parallel>, #tpu.dimension_semantics<arbitrary>], iteration_bounds = array<i64: 2, 1, 1>, scalar_prefetch = 0 : i64, scratch_operands = 0 : i64, tpu.core_type = #tpu.core_type<tc>, window_params = [{transform_indices = @transform_0, window_bounds = array<i64: 1, 4, 256>}, {transform_indices = @transform_1, window_bounds = array<i64: 1, 1, 4, 4>}, {transform_indices = @transform_2, window_bounds = array<i64: 1, 1, 4, 1>}]} {
    %c0_i32 = arith.constant 0 : i32
    %0 = arith.cmpi eq, %arg2, %c0_i32 : i32
    %1 = arith.extui %0 : i1 to i32
    %c0_i32_0 = arith.constant 0 : i32
    %2 = arith.cmpi ne, %1, %c0_i32_0 : i32
    scf.if %2 {
      %cst_22 = arith.constant 0.000000e+00 : f32
      %29 = vector.broadcast %cst_22 : f32 to vector<4x4xf32>
      %c0_23 = arith.constant 0 : index
      %c0_24 = arith.constant 0 : index
      %c0_25 = arith.constant 0 : index
      %c0_26 = arith.constant 0 : index
      %30 = vector.load %arg4[%c0_23, %c0_24, %c0_25, %c0_26] : memref<1x1x4x4xf32, #tpu.memory_space<vmem>>, vector<1x1x4x4xf32>
      %31 = vector.shape_cast %30 : vector<1x1x4x4xf32> to vector<4x4xf32>
      %32 = vector.shape_cast %29 : vector<4x4xf32> to vector<1x1x4x4xf32>
      tpu.vector_store %arg4[%c0_23, %c0_24, %c0_25, %c0_26], %32 {strides = array<i32>} : memref<1x1x4x4xf32, #tpu.memory_space<vmem>>, vector<1x1x4x4xf32>,
      %cst_27 = arith.constant 0.000000e+00 : f32
      %33 = vector.broadcast %cst_27 : f32 to vector<4x1xf32>
      %c0_28 = arith.constant 0 : index
      %c0_29 = arith.constant 0 : index
      %c0_30 = arith.constant 0 : index
      %c0_31 = arith.constant 0 : index
      %34 = vector.load %arg5[%c0_28, %c0_29, %c0_30, %c0_31] : memref<1x1x4x1xf32, #tpu.memory_space<vmem>>, vector<1x1x4x1xf32>
      %35 = vector.shape_cast %34 : vector<1x1x4x1xf32> to vector<4x1xf32>
      %36 = vector.shape_cast %33 : vector<4x1xf32> to vector<1x1x4x1xf32>
      tpu.vector_store %arg5[%c0_28, %c0_29, %c0_30, %c0_31], %36 {strides = array<i32>} : memref<1x1x4x1xf32, #tpu.memory_space<vmem>>, vector<1x1x4x1xf32>,
    } else {
    }
    %c1_i32 = arith.constant 1 : i32
    %3 = arith.muli %arg1, %c1_i32 : i32
    %4 = arith.addi %3, %arg2 : i32
    %c256_i32 = arith.constant 256 : i32
    %5 = arith.muli %4, %c256_i32 : i32
    %c256_i32_1 = arith.constant 256 : i32
    %6 = arith.subi %c256_i32_1, %5 : i32
    %7 = tpu.iota {dimensions = array<i32: 1>} : vector<4x256xi32>
    %c0 = arith.constant 0 : index
    %c0_2 = arith.constant 0 : index
    %c0_3 = arith.constant 0 : index
    %8 = vector.load %arg3[%c0, %c0_2, %c0_3] : memref<1x4x256xf32, #tpu.memory_space<vmem>>, vector<1x4x256xf32>
    %9 = vector.shape_cast %8 : vector<1x4x256xf32> to vector<4x256xf32>
    %10 = vector.broadcast %6 : i32 to vector<4x256xi32>
    %11 = arith.cmpi slt, %7, %10 : vector<4x256xi32>
    %cst = arith.constant 0.000000e+00 : f32
    %12 = vector.broadcast %cst : f32 to vector<4x256xf32>
    %13 = arith.select %11, %9, %12 : vector<4x256xi1>, vector<4x256xf32>
    %c0_4 = arith.constant 0 : index
    %c0_5 = arith.constant 0 : index
    %c0_6 = arith.constant 0 : index
    %c0_7 = arith.constant 0 : index
    %14 = vector.load %arg4[%c0_4, %c0_5, %c0_6, %c0_7] : memref<1x1x4x4xf32, #tpu.memory_space<vmem>>, vector<1x1x4x4xf32>
    %15 = vector.shape_cast %14 : vector<1x1x4x4xf32> to vector<4x4xf32>
    %cst_8 = arith.constant dense<0.000000e+00> : vector<4x4xf32>
    %16 = tpu.matmul %13, %13, %cst_8 {dimension_numbers = #tpu.dot_dimension_numbers<[1], [1], [0], [0], [0, 0, 1, 0], [], []>} : vector<4x256xf32>, vector<4x256xf32>, vector<4x4xf32> -> vector<4x4xf32>
    %17 = arith.addf %15, %16 : vector<4x4xf32>
    %c0_9 = arith.constant 0 : index
    %c0_10 = arith.constant 0 : index
    %c0_11 = arith.constant 0 : index
    %c0_12 = arith.constant 0 : index
    %18 = vector.load %arg4[%c0_9, %c0_10, %c0_11, %c0_12] : memref<1x1x4x4xf32, #tpu.memory_space<vmem>>, vector<1x1x4x4xf32>
    %19 = vector.shape_cast %18 : vector<1x1x4x4xf32> to vector<4x4xf32>
    %20 = vector.shape_cast %17 : vector<4x4xf32> to vector<1x1x4x4xf32>
    tpu.vector_store %arg4[%c0_9, %c0_10, %c0_11, %c0_12], %20 {strides = array<i32>} : memref<1x1x4x4xf32, #tpu.memory_space<vmem>>, vector<1x1x4x4xf32>,
    %c0_13 = arith.constant 0 : index
    %c0_14 = arith.constant 0 : index
    %c0_15 = arith.constant 0 : index
    %c0_16 = arith.constant 0 : index
    %21 = vector.load %arg5[%c0_13, %c0_14, %c0_15, %c0_16] : memref<1x1x4x1xf32, #tpu.memory_space<vmem>>, vector<1x1x4x1xf32>
    %22 = vector.shape_cast %21 : vector<1x1x4x1xf32> to vector<4x1xf32>
    %cst_17 = arith.constant dense<0.000000e+00> : vector<4xf32>
    %23 = vector.multi_reduction <add>, %13, %cst_17 [1] : vector<4x256xf32> to vector<4xf32>
    %24 = vector.shape_cast %23 : vector<4xf32> to vector<4x1xf32>
    %25 = arith.addf %22, %24 : vector<4x1xf32>
    %c0_18 = arith.constant 0 : index
    %c0_19 = arith.constant 0 : index
    %c0_20 = arith.constant 0 : index
    %c0_21 = arith.constant 0 : index
    %26 = vector.load %arg5[%c0_18, %c0_19, %c0_20, %c0_21] : memref<1x1x4x1xf32, #tpu.memory_space<vmem>>, vector<1x1x4x1xf32>
    %27 = vector.shape_cast %26 : vector<1x1x4x1xf32> to vector<4x1xf32>
    %28 = vector.shape_cast %25 : vector<4x1xf32> to vector<1x1x4x1xf32>
    tpu.vector_store %arg5[%c0_18, %c0_19, %c0_20, %c0_21], %28 {strides = array<i32>} : memref<1x1x4x1xf32, #tpu.memory_space<vmem>>, vector<1x1x4x1xf32>,
    return
  }
  func.func @transform_0(%arg0: i32, %arg1: i32, %arg2: i32) -> (i32, i32, i32) {
    %c1_i32 = arith.constant 1 : i32
    %0 = arith.muli %arg1, %c1_i32 : i32
    %1 = arith.addi %0, %arg2 : i32
    %c0_i32 = arith.constant 0 : i32
    %2 = arith.minsi %1, %c0_i32 : i32
    %c0_i32_0 = arith.constant 0 : i32
    %c0_i32_1 = arith.constant 0 : i32
    return %arg0, %c0_i32_0, %2 : i32, i32, i32
  }
  func.func @transform_1(%arg0: i32, %arg1: i32, %arg2: i32) -> (i32, i32, i32, i32) {
    %c0_i32 = arith.constant 0 : i32
    %c0_i32_0 = arith.constant 0 : i32
    %c0_i32_1 = arith.constant 0 : i32
    return %arg0, %arg1, %c0_i32, %c0_i32_0 : i32, i32, i32, i32
  }
  func.func @transform_2(%arg0: i32, %arg1: i32, %arg2: i32) -> (i32, i32, i32, i32) {
    %c0_i32 = arith.constant 0 : i32
    %c0_i32_0 = arith.constant 0 : i32
    %c0_i32_1 = arith.constant 0 : i32
    return %arg0, %arg1, %c0_i32, %c0_i32_0 : i32, i32, i32, i32
  }
}

module attributes {stable_mosaic.version = 11 : i64} {
  func.func @conv_bn_kernel(%arg0: i32, %arg1: i32, %arg2: memref<1x4x256xf32, #tpu.memory_space<vmem>>, %arg3: memref<8x4xf32, #tpu.memory_space<vmem>>, %arg4: memref<8x1xf32, #tpu.memory_space<vmem>>, %arg5: memref<8x1xf32, #tpu.memory_space<vmem>>, %arg6: memref<1x8x256xf32, #tpu.memory_space<vmem>>) attributes {dimension_semantics = [#tpu.dimension_semantics<parallel>, #tpu.dimension_semantics<parallel>], iteration_bounds = array<i64: 2, 1>, scalar_prefetch = 0 : i64, scratch_operands = 0 : i64, tpu.core_type = #tpu.core_type<tc>, window_params = [{transform_indices = @transform_0, window_bounds = array<i64: 1, 4, 256>}, {pipeline_mode = #tpu.pipeline_mode<synchronous>, transform_indices = @transform_1, window_bounds = array<i64: 8, 4>}, {pipeline_mode = #tpu.pipeline_mode<synchronous>, transform_indices = @transform_2, window_bounds = array<i64: 8, 1>}, {pipeline_mode = #tpu.pipeline_mode<synchronous>, transform_indices = @transform_3, window_bounds = array<i64: 8, 1>}, {transform_indices = @transform_4, window_bounds = array<i64: 1, 8, 256>}]} {
    %c0 = arith.constant 0 : index
    %c0_0 = arith.constant 0 : index
    %0 = vector.load %arg3[%c0, %c0_0] : memref<8x4xf32, #tpu.memory_space<vmem>>, vector<8x4xf32>
    %c0_1 = arith.constant 0 : index
    %c0_2 = arith.constant 0 : index
    %c0_3 = arith.constant 0 : index
    %1 = vector.load %arg2[%c0_1, %c0_2, %c0_3] : memref<1x4x256xf32, #tpu.memory_space<vmem>>, vector<1x4x256xf32>
    %2 = vector.shape_cast %1 : vector<1x4x256xf32> to vector<4x256xf32>
    %cst = arith.constant dense<0.000000e+00> : vector<8x256xf32>
    %3 = tpu.matmul %0, %2, %cst {dimension_numbers = #tpu.dot_dimension_numbers<[1], [0], [0], [1], [0, 0, 1, 1], [], []>} : vector<8x4xf32>, vector<4x256xf32>, vector<8x256xf32> -> vector<8x256xf32>
    %c0_4 = arith.constant 0 : index
    %c0_5 = arith.constant 0 : index
    %4 = vector.load %arg4[%c0_4, %c0_5] : memref<8x1xf32, #tpu.memory_space<vmem>>, vector<8x1xf32>
    %5 = vector.broadcast %4 : vector<8x1xf32> to vector<8x256xf32>
    %6 = arith.mulf %3, %5 : vector<8x256xf32>
    %c0_6 = arith.constant 0 : index
    %c0_7 = arith.constant 0 : index
    %7 = vector.load %arg5[%c0_6, %c0_7] : memref<8x1xf32, #tpu.memory_space<vmem>>, vector<8x1xf32>
    %8 = vector.broadcast %7 : vector<8x1xf32> to vector<8x256xf32>
    %9 = arith.addf %6, %8 : vector<8x256xf32>
    %c0_8 = arith.constant 0 : index
    %c0_9 = arith.constant 0 : index
    %c0_10 = arith.constant 0 : index
    %10 = vector.load %arg6[%c0_8, %c0_9, %c0_10] : memref<1x8x256xf32, #tpu.memory_space<vmem>>, vector<1x8x256xf32>
    %11 = vector.shape_cast %10 : vector<1x8x256xf32> to vector<8x256xf32>
    %12 = vector.shape_cast %9 : vector<8x256xf32> to vector<1x8x256xf32>
    tpu.vector_store %arg6[%c0_8, %c0_9, %c0_10], %12 {strides = array<i32>} : memref<1x8x256xf32, #tpu.memory_space<vmem>>, vector<1x8x256xf32>,
    return
  }
  func.func @transform_0(%arg0: i32, %arg1: i32) -> (i32, i32, i32) {
    %c0_i32 = arith.constant 0 : i32
    %c0_i32_0 = arith.constant 0 : i32
    return %arg0, %c0_i32, %arg1 : i32, i32, i32
  }
  func.func @transform_1(%arg0: i32, %arg1: i32) -> (i32, i32) {
    %c0_i32 = arith.constant 0 : i32
    %c0_i32_0 = arith.constant 0 : i32
    %c0_i32_1 = arith.constant 0 : i32
    return %c0_i32, %c0_i32_0 : i32, i32
  }
  func.func @transform_2(%arg0: i32, %arg1: i32) -> (i32, i32) {
    %c0_i32 = arith.constant 0 : i32
    %c0_i32_0 = arith.constant 0 : i32
    %c0_i32_1 = arith.constant 0 : i32
    return %c0_i32, %c0_i32_0 : i32, i32
  }
  func.func @transform_3(%arg0: i32, %arg1: i32) -> (i32, i32) {
    %c0_i32 = arith.constant 0 : i32
    %c0_i32_0 = arith.constant 0 : i32
    %c0_i32_1 = arith.constant 0 : i32
    return %c0_i32, %c0_i32_0 : i32, i32
  }
  func.func @transform_4(%arg0: i32, %arg1: i32) -> (i32, i32, i32) {
    %c0_i32 = arith.constant 0 : i32
    %c0_i32_0 = arith.constant 0 : i32
    return %arg0, %c0_i32, %arg1 : i32, i32, i32
  }
}

</mosaic_0001>

<bundles_post_ra>
// kernel: downsample_forward.2
= control target key start
LH: loop header
LB: loop body
LE: loop exit
PB: predicated region body
PF: predicated region fallthrough
CT: control target
= control target key end

     0   :  { %s531_s9 = smov 0   ;;  %s533_s10 = smov 0   ;;  %s569_s0 = inlined_call_operand.vmem [shape: f32[2,4,256], index: 0, kind: input, shape index: {}]   ;;  %s570_s1 = inlined_call_operand.vmem [shape: f32[2,1,4,4], index: 1, kind: output, shape index: {0}]   ;;  %s571_s2 = inlined_call_operand.vmem [shape: f32[2,1,4,1], index: 2, kind: output, shape index: {1}]  }
   0x1   :  { %s535_s11 = smov 0  }
   0x2 LB: > { %s32_s12 = sadd.s32 1, %s509_s10  ;;  %p457_p0 = scmp.ge.s32.totalorder %s513_s11, 1  ;;  %s513_s11 = sphi %s535_s11, %s13_s11   ;;  %s509_s10 = sphi %s533_s10, %s573_s10   ;;  %s505_s9 = sphi %s531_s9, %s572_s9  }
   0x3   : > { %p34_p1 = scmp.ge.s32.totalorder %s32_s12, 2  ;;  %p157_p2 = scmp.lt.s32.totalorder %s513_s11, 3 }
   0x5   : > { %s575_s12 = smov (%p34_p1, %s32_s12), 0  ;;  %p158_p3 = pnand %p457_p0, %p157_p2 }
   0x6   : > { %p199_p4 = scmp.lt.s32.totalorder (!%p158_p3), %s505_s9, 1  ;;  %vm229_vm0 = vcmask (!%p158_p3), 27648   ;;  %vm323_vm1 = vcmask (!%p158_p3), 1043456   ;;  %v515_v1 = vmov (!%p158_p3), 0.0   ;;  %vm231_vm2 = vcmask (!%p158_p3), 3072  }
   0x7   : > { %161 = sbr.rel (%p158_p3) target bundleno = 239 (0xef), region = 24 }
   0xe   : > { %s577_s9 = smov (!%p199_p4, %s505_s9), 1 }
   0xf   : > { %s464_s13 = sshll.u32 %s577_s9, 3  ;;  %s460_s14 = sshll.u32 %s577_s9, 2 }
  0x10   : > { %s206_s17 = scalar_lea.vmem %s569_s0, %s464_s13  ;;  %s217_s20 = scalar_lea.vmem %s570_s1, %s460_s14 }
  0x11   : > { %v239_v0 = vld [vmem:[%s206_s17] sm:$0xff]  ;;  %230 = vst.msk [vmem:[%s217_s20] sm:$0xf] %vm229_vm0, %v515_v1  ;;  %s224_s23 = scalar_lea.vmem %s571_s2, %s460_s14 }
  0x12   : > { %v244_v2 = vcombine.high %v239_v0, %v239_v0  ;;  %v324_v3 = vsel %vm323_vm1, %v239_v0, 0.0  ;;  %232 = vst.msk [vmem:[%s224_s23] sm:$0xf] %vm231_vm2, %v515_v1 }
  0x14   : > { %249 = vmatprep.subr.mxu0 %v244_v2  ;;  %313 = vmatprep.mubr.f32.mxu0 %v244_v2  ;;  %v325_v4 = vsel %vm323_vm1, %v244_v2, 0.0 }
  0x15   : > { %250 = vmatpush1.xpose.msra.mxu0 %v239_v0  ;;  %v326_v5 = vadd.f32 %v325_v4, %v324_v3 }
  0x17   : > { %327 = vadd.xlane.f32.xlu0 %v326_v5 }
  0x18   : > { %314 = vmatmul.mubr.f32.vlgmr.msra.gmra.mrb[0].mxu0 %v239_v0  ;;  %v248_v9 = vld [vmem:[%s217_s20] sm:$0xf] }
  0x19   : > { %v322_v6 = vld [vmem:[%s224_s23] sm:$0xf] }
  0xa4   : > { %v328_v7 = vpop.xlane.xlu0 %327 }
  0xa5   : > { %v329_v8 = vadd.f32 %v328_v7, %v322_v6 }
  0xa7   : > { %331 = vst.msk [vmem:[%s224_s23] sm:$0xf] %vm231_vm2, %v329_v8 }
  0xeb   : > { %v315_v10 = vpop.f32.mrb[0].mxu0 }
  0xec   : > { %v319_v11 = vadd.f32 %v315_v10, %v248_v9  ;;  %v317_v12 = vpop.f32.mrb[1].mxu0 }
  0xee   : > { %321 = vst.msk [vmem:[%s217_s20] sm:$0xf] %vm229_vm0, %v319_v11 }
  0xef PF: > { %s13_s11 = sadd.s32 1, %s513_s11   ;;  %s572_s9 = smov %s509_s10 }
  0xf0   : > { %p10_p5 = scmp.ge.s32.totalorder %s13_s11, 4   ;;  %s573_s10 = smov %s575_s12 }
  0xf2   :  { %12 = sbr.rel (!%p10_p5) target bundleno = 2 (0x2), region = 70 }

// kernel: downsample_forward.3
= control target key start
LH: loop header
LB: loop body
LE: loop exit
PB: predicated region body
PF: predicated region fallthrough
CT: control target
= control target key end

     0   :  { %s521_s15 = smov 0   ;;  %s523_s16 = smov 0   ;;  %s563_s0 = inlined_call_operand.vmem [shape: f32[2,4,256], index: 0, kind: input, shape index: {}]   ;;  %s564_s1 = inlined_call_operand.vmem [shape: f32[8,4], index: 1, kind: input, shape index: {}]   ;;  %s565_s2 = inlined_call_operand.vmem [shape: f32[8,1], index: 2, kind: input, shape index: {}]   ;;  %s566_s3 = inlined_call_operand.vmem [shape: f32[8,1], index: 3, kind: input, shape index: {}]   ;;  %s567_s4 = inlined_call_operand.vmem [shape: f32[2,8,256], index: 4, kind: output, shape index: {}]  }
   0x1   :  { %s525_s17 = smov 0  }
   0x2 LB: > { %s26_s18 = sadd.s32 1, %s488_s16  ;;  %p430_p0 = scmp.ge.s32.totalorder %s492_s17, 1  ;;  %s492_s17 = sphi %s525_s17, %s14_s17   ;;  %s488_s16 = sphi %s523_s16, %s569_s16   ;;  %s484_s15 = sphi %s521_s15, %s568_s15  }
   0x3   : > { %p28_p1 = scmp.ge.s32.totalorder %s26_s18, 2  ;;  %p183_p2 = scmp.lt.s32.totalorder %s492_s17, 3 }
   0x5   : > { %s571_s18 = smov (%p28_p1, %s26_s18), 0  ;;  %p184_p3 = pnand %p430_p0, %p183_p2 }
   0x6   : > { %p218_p4 = scmp.lt.s32.totalorder (!%p184_p3), %s484_s15, 1  ;;  %v494_v0 = vmov (!%p184_p3), 0.0   ;;  %v495_v1 = vmov (!%p184_p3), 0   ;;  %v321_v2 = vld [vmem:[%s565_s2] sm:$0xff] (!%p184_p3)  ;;  %vm245_vm0 = vcmask (!%p184_p3), 1043456   ;;  %vm241_vm1 = vcmask (!%p184_p3), 31744  }
   0x7   : > { %187 = sbr.rel (%p184_p3) target bundleno = 240 (0xf0), region = 36  ;;  %314 = vmatprep.mubr.f32.mxu0 (!%p184_p3), %v494_v0  ;;  %468 = vset.pattern.permute.xlu0 (!%p184_p3), %v495_v1  ;;  %v329_v3 = vld [vmem:[%s566_s3] sm:$0xff] (!%p184_p3) }
   0x8   : > { %324 = vperm.xlu0 (!%p184_p3), %468, %v321_v2   ;;  %v237_v6 = vld [vmem:[%s564_s1] sm:$0xff] (!%p184_p3) }
   0xc   : > { %332 = vperm.xlu0 (!%p184_p3), %468, %v329_v3  }
   0xe   : > { %s573_s15 = smov (!%p218_p4, %s484_s15), 1 }
   0xf   : > { %s440_s23 = sshll.u32 %s573_s15, 3  ;;  %s441_s29 = sshll.u32 %s573_s15, 4 }
  0x10   : > { %s225_s26 = scalar_lea.vmem %s563_s0, %s440_s23  ;;  %s235_s6 = scalar_lea.vmem %s567_s4, %s441_s29 }
  0x11   : > { %v238_v4 = vld [vmem:[%s225_s26] sm:$0xff] }
  0x12   : > { %v240_v5 = vcombine.high %v238_v4, %v238_v4 }
  0x14   : > { %435 = vmatprep.subr.msk.mxu0 %vm245_vm0, %v240_v5 }
  0x15   : > { %436 = vmatpush1.msk.msra.mxu0 %vm245_vm0, %v238_v4 }
  0x16   : > { %437 = vmatmul.mubr.msk.f32.vlgmr.msra.gmra.mrb[0].mxu0 %vm241_vm1, %v237_v6 }
  0x87   : > { %v325_v7 = vpop.permute.xlu0 %324 }
  0x8b   : > { %v333_v11 = vpop.permute.xlu0 %332 }
  0xe9   : > { %v316_v8 = vpop.f32.mrb[0].mxu0 }
  0xea   : > { %v327_v9 = vmul.f32 %v325_v7, %v316_v8  ;;  %v318_v10 = vpop.f32.mrb[1].mxu0 }
  0xeb   : > { %v328_v12 = vmul.f32 %v325_v7, %v318_v10 }
  0xec   : > { %v335_v13 = vadd.f32 %v333_v11, %v327_v9 }
  0xed   : > { %v336_v14 = vadd.f32 %v333_v11, %v328_v12 }
  0xee   : > { %337 = vst [vmem:[%s235_s6] sm:$0xff] %v335_v13 }
  0xef   : > { %338 = vst [vmem:[%s235_s6 + $0x8] sm:$0xff] %v336_v14 }
  0xf0 PF: > { %s14_s17 = sadd.s32 1, %s492_s17   ;;  %s568_s15 = smov %s488_s16 }
  0xf1   : > { %p11_p5 = scmp.ge.s32.totalorder %s14_s17, 4   ;;  %s569_s16 = smov %s571_s18 }
  0xf3   :  { %13 = sbr.rel (!%p11_p5) target bundleno = 2 (0x2), region = 66 }

</bundles_post_ra>
